<compile_context>
chip_gen: v7x
topology: tpu7x:2x2x1
jax: 0.10.0
libtpu: 0.0.40
codegen_flags: <defaults>
</compile_context>

<pallas_src>
import jax
import jax.numpy as jnp
from jax.experimental import pallas as pl
from jax.experimental.pallas import tpu as pltpu


def _make_kernel(k, p, H, W):
    HW = H * W

    def kernel(x_ref, aux_ref, o_ref):
        # x_ref:   (TC, HW)  planes on sublanes, flattened H*W on lanes
        # aux_ref: (2,  HW)  row 0 = row coordinate h(f), row 1 = 1/valid_count(f)
        x = x_ref[...].astype(jnp.float32)
        hv = aux_ref[0:1, :]            # (1, HW) f32 row coordinate per lane
        inv = aux_ref[1:2, :]           # (1, HW) f32 count_include_pad=False divisor

        # --- row (W-axis) pass: neighbours at flat offsets +-1..+-p ------------
        # A rolled-in element is a valid horizontal neighbour iff it comes from
        # the same image row (no wrap across a row edge).  Rolling the coordinate
        # vector with the same shift makes the mask roll-direction agnostic.
        rsum = x
        for d in range(1, p + 1):
            for s in sorted({d % HW, (HW - d) % HW}):
                if s == 0:
                    continue
                xr = pltpu.roll(x, s, axis=1)
                hr = pltpu.roll(hv, s, axis=1)
                rsum = rsum + xr * (hr == hv).astype(jnp.float32)

        # --- column (H-axis) pass: neighbours at flat offsets +-W..+-p*W --------
        # Valid vertical neighbour iff the row coordinate differs by exactly d
        # (top/bottom wraparound gives |dh| = H-d != d and is masked out).
        out = rsum
        for d in range(1, p + 1):
            for s in sorted({(d * W) % HW, (HW - d * W) % HW}):
                if s == 0:
                    continue
                rr = pltpu.roll(rsum, s, axis=1)
                hr = pltpu.roll(hv, s, axis=1)
                out = out + rr * (jnp.abs(hr - hv) == d).astype(jnp.float32)

        o_ref[...] = (out * inv).astype(o_ref.dtype)

    return kernel


def _choose_block_planes(NC, HW, itemsize):
    """Planes (sublanes) per grid step."""
    budget = 8 << 20                        # ~8 MiB/step working set: safe on v7x
    per_plane = 4 * HW * itemsize           # 2x input + 2x output blocks (double-buffered)
    cap = max(8, budget // max(per_plane, 1))
    if NC >= 256:
        cap = min(cap, NC // 2)             # keep >=2 grid steps for v7x's 2nd core
    if NC <= cap:
        return NC                           # block dim == full dim (always legal)
    tc = min(cap, NC)
    tc -= tc % 8                            # sublane-aligned block
    while tc > 8 and NC % tc:
        tc -= 8
    if tc >= 8 and NC % tc == 0:
        return tc
    return NC                               # TODO(synk): ragged-NC tail path


def avg_pool2d_pallas(x, kernel_size=3, stride=1, padding=1):
    """nn.AvgPool2d(kernel_size, stride=1, padding, count_include_pad=False) on NCHW x."""
    if stride != 1:
        raise NotImplementedError("POOLING forward uses stride=1")
    k, p = kernel_size, padding
    if k != 2 * p + 1:
        # TODO(synk): kernel_size != 2*padding+1 (output spatial != input spatial)
        # is not implemented in the Pallas path.
        raise NotImplementedError("Pallas path requires kernel_size == 2*padding + 1")

    N, C, H, W = x.shape
    NC, HW = N * C, H * W

    # Free relayout: NCHW is row-major, so (N,C,H,W) -> (N*C, H*W) is a pure
    # reshape (no HBM pass).  Planes -> sublanes, flattened spatial -> lanes.
    x2d = x.reshape(NC, HW)

    # Grid-invariant auxiliaries, computed once (resident block in the kernel):
    #   row 0: row coordinate h(f) of each flattened spatial position
    #   row 1: 1 / (# in-bounds taps)  -> count_include_pad=False divisor
    f = jnp.arange(HW, dtype=jnp.int32)
    h = f // W
    w = f % W
    cnt_h = jnp.minimum(h + p, H - 1) - jnp.maximum(h - p, 0) + 1
    cnt_w = jnp.minimum(w + p, W - 1) - jnp.maximum(w - p, 0) + 1
    inv_cnt = 1.0 / (cnt_h * cnt_w).astype(jnp.float32)
    aux = jnp.stack([h.astype(jnp.float32), inv_cnt], axis=0)   # (2, HW)

    TC = _choose_block_planes(NC, HW, x.dtype.itemsize)
    grid = (NC // TC,)

    out2d = pl.pallas_call(
        _make_kernel(k, p, H, W),
        out_shape=jax.ShapeDtypeStruct((NC, HW), x.dtype),
        grid=grid,
        in_specs=[
            pl.BlockSpec((TC, HW), lambda i: (i, 0)),   # plane block (lane-dense)
            pl.BlockSpec((2, HW), lambda i: (0, 0)),    # aux: same block -> fetched once
        ],
        out_specs=pl.BlockSpec((TC, HW), lambda i: (i, 0)),
        compiler_params=pltpu.CompilerParams(
            dimension_semantics=("parallel",),
            vmem_limit_bytes=32 << 20,
        ),
    )(x2d, aux)

    return out2d.reshape(N, C, H, W)


def _avg_pool2d_ref(x, kernel_size=3, padding=1):
    """Pure-JAX reference (count_include_pad=False) for correctness check."""
    k, p = kernel_size, padding
    win = (1, 1, k, k)
    strides = (1, 1, 1, 1)
    pads = ((0, 0), (0, 0), (p, p), (p, p))
    s = jax.lax.reduce_window(x, 0.0, jax.lax.add, win, strides, pads)
    cnt = jax.lax.reduce_window(jnp.ones_like(x), 0.0, jax.lax.add, win, strides, pads)
    return s / cnt


if __name__ == "__main__":
    key = jax.random.PRNGKey(0)
    # Small shapes consistent with the module: batch=2, channels=4, spatial=16.
    x = jax.random.normal(key, (2, 4, 16, 16), dtype=jnp.float32)

    y = avg_pool2d_pallas(x, kernel_size=3, stride=1, padding=1)
    y = jax.block_until_ready(y)

    y_ref = _avg_pool2d_ref(x, kernel_size=3, padding=1)
    assert y.shape == y_ref.shape == (2, 4, 16, 16)
    assert bool(jnp.allclose(y, y_ref, atol=1e-5, rtol=1e-5))

    print("KERNEL_OK")
</pallas_src>

<mosaic_0001>
module attributes {stable_mosaic.version = 11 : i64} {
  func.func @kernel(%arg0: i32, %arg1: memref<8x256xf32, #tpu.memory_space<vmem>>, %arg2: memref<2x256xf32, #tpu.memory_space<vmem>>, %arg3: memref<8x256xf32, #tpu.memory_space<vmem>>) attributes {dimension_semantics = [#tpu.dimension_semantics<parallel>], iteration_bounds = array<i64: 1>, scalar_prefetch = 0 : i64, scratch_operands = 0 : i64, tpu.core_type = #tpu.core_type<tc>, window_params = [{transform_indices = @transform_0, window_bounds = array<i64: 8, 256>}, {pipeline_mode = #tpu.pipeline_mode<synchronous>, transform_indices = @transform_1, window_bounds = array<i64: 2, 256>}, {transform_indices = @transform_2, window_bounds = array<i64: 8, 256>}]} {
    %c0 = arith.constant 0 : index
    %c0_0 = arith.constant 0 : index
    %0 = vector.load %arg1[%c0, %c0_0] : memref<8x256xf32, #tpu.memory_space<vmem>>, vector<8x256xf32>
    %c0_1 = arith.constant 0 : index
    %c0_2 = arith.constant 0 : index
    %1 = vector.load %arg2[%c0_1, %c0_2] : memref<2x256xf32, #tpu.memory_space<vmem>>, vector<1x256xf32>
    %c1 = arith.constant 1 : index
    %c0_3 = arith.constant 0 : index
    %2 = vector.load %arg2[%c1, %c0_3] : memref<2x256xf32, #tpu.memory_space<vmem>>, vector<1x256xf32>
    %c1_i32 = arith.constant 1 : i32
    %3 = tpu.dynamic_rotate %0 by %c1_i32 dim 1 : vector<8x256xf32>, i32 -> vector<8x256xf32>
    %c1_i32_4 = arith.constant 1 : i32
    %4 = tpu.dynamic_rotate %1 by %c1_i32_4 dim 1 : vector<1x256xf32>, i32 -> vector<1x256xf32>
    %5 = arith.cmpf oeq, %4, %1 : vector<1x256xf32>
    %6 = arith.extui %5 : vector<1x256xi1> to vector<1x256xi32>
    %7 = arith.sitofp %6 : vector<1x256xi32> to vector<1x256xf32>
    %8 = vector.broadcast %7 : vector<1x256xf32> to vector<8x256xf32>
    %9 = arith.mulf %3, %8 : vector<8x256xf32>
    %10 = arith.addf %0, %9 : vector<8x256xf32>
    %c255_i32 = arith.constant 255 : i32
    %11 = tpu.dynamic_rotate %0 by %c255_i32 dim 1 : vector<8x256xf32>, i32 -> vector<8x256xf32>
    %c255_i32_5 = arith.constant 255 : i32
    %12 = tpu.dynamic_rotate %1 by %c255_i32_5 dim 1 : vector<1x256xf32>, i32 -> vector<1x256xf32>
    %13 = arith.cmpf oeq, %12, %1 : vector<1x256xf32>
    %14 = arith.extui %13 : vector<1x256xi1> to vector<1x256xi32>
    %15 = arith.sitofp %14 : vector<1x256xi32> to vector<1x256xf32>
    %16 = vector.broadcast %15 : vector<1x256xf32> to vector<8x256xf32>
    %17 = arith.mulf %11, %16 : vector<8x256xf32>
    %18 = arith.addf %10, %17 : vector<8x256xf32>
    %c16_i32 = arith.constant 16 : i32
    %19 = tpu.dynamic_rotate %18 by %c16_i32 dim 1 : vector<8x256xf32>, i32 -> vector<8x256xf32>
    %c16_i32_6 = arith.constant 16 : i32
    %20 = tpu.dynamic_rotate %1 by %c16_i32_6 dim 1 : vector<1x256xf32>, i32 -> vector<1x256xf32>
    %21 = arith.subf %20, %1 : vector<1x256xf32>
    %22 = math.absf %21 : vector<1x256xf32>
    %cst = arith.constant 1.000000e+00 : f32
    %23 = vector.broadcast %cst : f32 to vector<1x256xf32>
    %24 = arith.cmpf oeq, %22, %23 : vector<1x256xf32>
    %25 = arith.extui %24 : vector<1x256xi1> to vector<1x256xi32>
    %26 = arith.sitofp %25 : vector<1x256xi32> to vector<1x256xf32>
    %27 = vector.broadcast %26 : vector<1x256xf32> to vector<8x256xf32>
    %28 = arith.mulf %19, %27 : vector<8x256xf32>
    %29 = arith.addf %18, %28 : vector<8x256xf32>
    %c240_i32 = arith.constant 240 : i32
    %30 = tpu.dynamic_rotate %18 by %c240_i32 dim 1 : vector<8x256xf32>, i32 -> vector<8x256xf32>
    %c240_i32_7 = arith.constant 240 : i32
    %31 = tpu.dynamic_rotate %1 by %c240_i32_7 dim 1 : vector<1x256xf32>, i32 -> vector<1x256xf32>
    %32 = arith.subf %31, %1 : vector<1x256xf32>
    %33 = math.absf %32 : vector<1x256xf32>
    %cst_8 = arith.constant 1.000000e+00 : f32
    %34 = vector.broadcast %cst_8 : f32 to vector<1x256xf32>
    %35 = arith.cmpf oeq, %33, %34 : vector<1x256xf32>
    %36 = arith.extui %35 : vector<1x256xi1> to vector<1x256xi32>
    %37 = arith.sitofp %36 : vector<1x256xi32> to vector<1x256xf32>
    %38 = vector.broadcast %37 : vector<1x256xf32> to vector<8x256xf32>
    %39 = arith.mulf %30, %38 : vector<8x256xf32>
    %40 = arith.addf %29, %39 : vector<8x256xf32>
    %41 = vector.broadcast %2 : vector<1x256xf32> to vector<8x256xf32>
    %42 = arith.mulf %40, %41 : vector<8x256xf32>
    %c0_9 = arith.constant 0 : index
    %c0_10 = arith.constant 0 : index
    %43 = vector.load %arg3[%c0_9, %c0_10] : memref<8x256xf32, #tpu.memory_space<vmem>>, vector<8x256xf32>
    tpu.vector_store %arg3[%c0_9, %c0_10], %42 {strides = array<i32>} : memref<8x256xf32, #tpu.memory_space<vmem>>, vector<8x256xf32>,
    return
  }
  func.func @transform_0(%arg0: i32) -> (i32, i32) {
    %c0_i32 = arith.constant 0 : i32
    %c0_i32_0 = arith.constant 0 : i32
    return %arg0, %c0_i32 : i32, i32
  }
  func.func @transform_1(%arg0: i32) -> (i32, i32) {
    %c0_i32 = arith.constant 0 : i32
    %c0_i32_0 = arith.constant 0 : i32
    %c0_i32_1 = arith.constant 0 : i32
    return %c0_i32, %c0_i32_0 : i32, i32
  }
  func.func @transform_2(%arg0: i32) -> (i32, i32) {
    %c0_i32 = arith.constant 0 : i32
    %c0_i32_0 = arith.constant 0 : i32
    return %arg0, %c0_i32 : i32, i32
  }
}

</mosaic_0001>

<bundles_post_ra>
// kernel: tpu_custom_call.1
= control target key start
LH: loop header
LB: loop body
LE: loop exit
PB: predicated region body
PF: predicated region fallthrough
CT: control target
= control target key end

     0   :  { %7 = vsyncpa [#allocation3], 0  ;;  %s450_s0 = inlined_call_operand.hbm [shape: f32[8,256], index: 0, kind: input, shape index: {}]   ;;  %s451_s1 = inlined_call_operand.hbm [shape: f32[2,256], index: 1, kind: input, shape index: {}]   ;;  %s452_s2 = inlined_call_operand.hbm [shape: f32[8,256], index: 2, kind: output, shape index: {}]  }
   0x1   :  { %8 = vsyncpa [#allocation6], 0 }
   0x2   :  { %9 = vsyncpa [#allocation4], 0  ;;  %s305_s9 = smov [#allocation2]   ;;  %s306_s11 = smov [#allocation5]  }
   0x3   :  { %s16_s10 = sshll.u32 %s305_s9, 4  ;;  %s26_s12 = sshll.u32 %s306_s11, 4  ;;  %s17_s10 = int_to_ptr.vmem [resolvable:$true] %s16_s10  ;;  %s27_s12 = int_to_ptr.vmem [resolvable:$true] %s26_s12 }
   0x4   :  { %s233_s15 = scalar_lea.hbm %s450_s0, 256 }
   0x5   :  { %p234_p0 = scmp.ne.s32.totalorder %s450_s0, %s233_s15  ;;  %p237_p1 = scmp.lt.u32.totalorder %s233_s15, %s450_s0 }
   0x7   :  { %p239_p2 = pnand %p237_p1, %p234_p0 }
   0x9   :  { %242 = shalt.err (!%p239_p2)
}
   0xa   :  { %s243_s20 = scalar_lea.vmem %s17_s10, 256  ;;  %p248_p4 = scmp.lt.s32.totalorder %s17_s10, %s17_s10 }
   0xb   :  { %p244_p3 = scmp.ne.s32.totalorder %s17_s10, %s243_s20  ;;  %p249_p5 = scmp.lt.s32.totalorder %s243_s20, %s243_s20 }
   0xd   :  { %p250_p6 = por %p249_p5, %p248_p4 }
   0xf   :  { %p251_p7 = pnand %p250_p6, %p244_p3 }
  0x11   :  { %254 = shalt.err (!%p251_p7)
}
  0x12   :  { %19 = dma.hbm_to_vmem [thread:$0]  %s450_s0, 256, %s17_s10, [#allocation3]  }
  0x13   :  { %s255_s25 = scalar_lea.hbm %s451_s1, 64 }
  0x14   :  { %p256_p8 = scmp.ne.s32.totalorder %s451_s1, %s255_s25  ;;  %p259_p9 = scmp.lt.u32.totalorder %s255_s25, %s451_s1 }
  0x16   :  { %p261_p10 = pnand %p259_p9, %p256_p8 }
  0x18   :  { %264 = shalt.err (!%p261_p10)
}
  0x19   :  { %s265_s30 = scalar_lea.vmem %s27_s12, 64  ;;  %p270_p12 = scmp.lt.s32.totalorder %s27_s12, %s27_s12 }
  0x1a   :  { %p266_p11 = scmp.ne.s32.totalorder %s27_s12, %s265_s30  ;;  %p271_p13 = scmp.lt.s32.totalorder %s265_s30, %s265_s30 }
  0x1c   :  { %p272_p0 = por %p271_p13, %p270_p12 }
  0x1e   :  { %p273_p1 = pnand %p272_p0, %p266_p11 }
  0x20   :  { %276 = shalt.err (!%p273_p1)
}
  0x21   :  { %29 = dma.hbm_to_vmem [thread:$0]  %s451_s1, 64, %s27_s12, [#allocation6]  }
  0x22   :  { %299 = dma.done.wait [#allocation3], 256  }
  0x23   :  { %300 = vsyncadd [#allocation3], 4294967040 }
  0x24   :  { %301 = dma.done.wait [#allocation6], 64  }
  0x25   :  { %302 = vsyncadd [#allocation6], 4294967232  ;;  %v45_v0 = vlaneseq  ;;  %v37_v4 = vld [vmem:[#allocation2 + $0x8] sm:$0xff]  ;;  %v38_v5 = vld [vmem:[#allocation5] ss:$2 sm:$0x3] }
  0x26   :  { %s307_s4 = smov 1   ;;  %s308_s1 = smov 127   ;;  %v36_v8 = vld [vmem:[#allocation2] sm:$0xff]  ;;  %v311_v17 = vmov 0.0  }
  0x27   :  { %v352_v1 = vshrl.u32 %v45_v0, 7  ;;  %43 = vrot.lane.b32.xlu1 %v37_v4, %s307_s4  ;;  %s309_s5 = smov 16   ;;  %s310_s6 = smov 112   ;;  %v377_v10 = vand.u32 127, %v45_v0 }
  0x28   :  { %s312_s7 = smov [#allocation7]  }
  0x29   :  { %v355_v2 = vsub.s32 0, %v352_v1  ;;  %v57_v3 = vsub.s32 1, %v352_v1  ;;  %vm47_vm0 = vcmp.lt.s32.totalorder %v377_v10, 1  ;;  %vm89_vm1 = vcmp.lt.s32.totalorder %v377_v10, 127  ;;  %s207_s8 = sshll.u32 %s312_s7, 4  ;;  %s208_s8 = int_to_ptr.vmem [resolvable:$true] %s207_s8 }
  0x2a   :  { %vm120_vm6 = vcmp.lt.s32.totalorder %v377_v10, 16  ;;  %vm155_vm7 = vcmp.lt.s32.totalorder %v377_v10, 112  ;;  %s277_s9 = scalar_lea.vmem %s208_s8, 256  ;;  %p282_p3 = scmp.lt.s32.totalorder %s208_s8, %s208_s8 }
  0x2b   :  { %v359_v6 = vrot.slane %v38_v5, %v355_v2  ;;  %v364_v7 = vrot.slane %v38_v5, %v57_v3  ;;  %p278_p2 = scmp.ne.s32.totalorder %s208_s8, %s277_s9  ;;  %p283_p4 = scmp.lt.s32.totalorder %s277_s9, %s277_s9 }
  0x2d   :  { %61 = vrot.lane.b32.xlu0 %v359_v6, %s307_s4  ;;  %92 = vrot.lane.b32.xlu1 %v359_v6, %s308_s1  ;;  %p284_p5 = por %p283_p4, %p282_p3 }
  0x2f   :  { %p285_p6 = pnand %p284_p5, %p278_p2 }
  0x31   :  { %63 = vrot.lane.b32.xlu0 %v364_v7, %s307_s4  ;;  %94 = vrot.lane.b32.xlu1 %v364_v7, %s308_s1 }
  0x35   :  { %41 = vrot.lane.b32.xlu0 %v36_v8, %s307_s4  ;;  %87 = vrot.lane.b32.xlu1 %v37_v4, %s308_s1 }
  0x39   :  { %85 = vrot.lane.b32.xlu0 %v36_v8, %s308_s1  ;;  %125 = vrot.lane.b32.xlu1 %v364_v7, %s309_s5 }
  0x3d   :  { %123 = vrot.lane.b32.xlu0 %v359_v6, %s309_s5  ;;  %160 = vrot.lane.b32.xlu1 %v364_v7, %s310_s6 }
  0x41   :  { %158 = vrot.lane.b32.xlu0 %v359_v6, %s310_s6 }
  0x99   :  { %v44_v9 = vpop.permute.xlu1 %43 }
  0x9f   :  { %v62_v11 = vpop.permute.xlu0 %61  ;;  %v93_v12 = vpop.permute.xlu1 %92 }
  0xa3   :  { %v64_v13 = vpop.permute.xlu0 %63  ;;  %v95_v16 = vpop.permute.xlu1 %94 }
  0xa4   :  { %v65_v14 = vsel %vm47_vm0, %v62_v11, %v64_v13  ;;  %v66_v15 = vsel %vm47_vm0, %v64_v13, %v62_v11  ;;  %v96_v20 = vsel %vm89_vm1, %v93_v12, %v95_v16  ;;  %v97_v21 = vsel %vm89_vm1, %v95_v16, %v93_v12  ;;  %v40_v13 = vld [vmem:[#allocation5 + $0x1] ss:$2 sm:$0x3] }
  0xa5   :  { %vm67_vm2 = vcmp.eq.f32.partialorder %v66_v15, %v359_v6  ;;  %vm68_vm3 = vcmp.eq.f32.partialorder %v65_v14, %v364_v7  ;;  %vm98_vm4 = vcmp.eq.f32.partialorder %v96_v20, %v359_v6  ;;  %vm99_vm5 = vcmp.eq.f32.partialorder %v97_v21, %v364_v7 }
  0xa6   :  { %v217_v18 = vsel %vm67_vm2, 1.0, %v311_v17  ;;  %v218_v19 = vsel %vm68_vm3, 1.0, %v311_v17  ;;  %v219_v25 = vsel %vm98_vm4, 1.0, %v311_v17  ;;  %v220_v26 = vsel %vm99_vm5, 1.0, %v311_v17 }
  0xa7   :  { %v76_v22 = vrot.slane %v217_v18, %v355_v2  ;;  %v80_v23 = vrot.slane %v218_v19, %v355_v2  ;;  %v42_v24 = vpop.permute.xlu0 %41  ;;  %v88_v31 = vpop.permute.xlu1 %87  ;;  %v107_v32 = vrot.slane %v219_v25, %v355_v2  ;;  %v111_v33 = vrot.slane %v220_v26, %v355_v2 }
  0xa8   :  { %v48_v27 = vsel %vm47_vm0, %v42_v24, %v44_v9  ;;  %v49_v28 = vsel %vm47_vm0, %v44_v9, %v42_v24  ;;  %v190_v18 = vrot.slane %v40_v13, %v355_v2  ;;  %v194_v19 = vrot.slane %v40_v13, %v57_v3 }
  0xa9   :  { %v81_v29 = vmul.f32 %v76_v22, %v49_v28  ;;  %v82_v30 = vmul.f32 %v80_v23, %v48_v27 }
  0xab   :  { %v86_v34 = vpop.permute.xlu0 %85  ;;  %v83_v37 = vadd.f32 %v81_v29, %v36_v8  ;;  %v84_v38 = vadd.f32 %v82_v30, %v37_v4  ;;  %v126_v41 = vpop.permute.xlu1 %125 }
  0xac   :  { %v90_v35 = vsel %vm89_vm1, %v86_v34, %v88_v31  ;;  %v91_v36 = vsel %vm89_vm1, %v88_v31, %v86_v34 }
  0xad   :  { %v112_v39 = vmul.f32 %v107_v32, %v90_v35  ;;  %v113_v40 = vmul.f32 %v111_v33, %v91_v36 }
  0xaf   :  { %v115_v42 = vadd.f32 %v113_v40, %v84_v38  ;;  %v114_v43 = vadd.f32 %v112_v39, %v83_v37  ;;  %v124_v44 = vpop.permute.xlu0 %123  ;;  %v161_v49 = vpop.permute.xlu1 %160 }
  0xb0   :  { %v127_v45 = vsel %vm120_vm6, %v124_v44, %v126_v41  ;;  %v128_v46 = vsel %vm120_vm6, %v126_v41, %v124_v44 }
  0xb1   :  { %118 = vrot.lane.b32.xlu1 %v115_v42, %s309_s5  ;;  %116 = vrot.lane.b32.xlu0 %v114_v43, %s309_s5  ;;  %v129_v47 = vsub.f32 %v128_v46, %v359_v6  ;;  %v130_v48 = vsub.f32 %v127_v45, %v364_v7 }
  0xb3   :  { %v131_v50 = vand.u32 2147483647, %v129_v47  ;;  %v132_v51 = vand.u32 2147483647, %v130_v48  ;;  %v159_v52 = vpop.permute.xlu0 %158 }
  0xb4   :  { %v162_v53 = vsel %vm155_vm7, %v159_v52, %v161_v49  ;;  %v163_v54 = vsel %vm155_vm7, %v161_v49, %v159_v52 }
  0xb5   :  { %153 = vrot.lane.b32.xlu1 %v115_v42, %s310_s6  ;;  %151 = vrot.lane.b32.xlu0 %v114_v43, %s310_s6  ;;  %vm133_vm8 = vcmp.eq.f32.partialorder %v131_v50, 1.0  ;;  %vm134_vm9 = vcmp.eq.f32.partialorder %v132_v51, 1.0  ;;  %v164_v55 = vsub.f32 %v162_v53, %v359_v6  ;;  %v165_v56 = vsub.f32 %v163_v54, %v364_v7 }
  0xb6   :  { %v221_v57 = vsel %vm133_vm8, 1.0, %v311_v17  ;;  %v222_v58 = vsel %vm134_vm9, 1.0, %v311_v17 }
  0xb7   :  { %v166_v59 = vand.u32 2147483647, %v164_v55  ;;  %v167_v60 = vand.u32 2147483647, %v165_v56  ;;  %v142_v63 = vrot.slane %v221_v57, %v355_v2  ;;  %v146_v0 = vrot.slane %v222_v58, %v355_v2 }
  0xb9   :  { %vm168_vm10 = vcmp.eq.f32.partialorder %v166_v59, 1.0  ;;  %vm169_vm11 = vcmp.eq.f32.partialorder %v167_v60, 1.0 }
  0xba   :  { %v223_v61 = vsel %vm168_vm10, 1.0, %v311_v17  ;;  %v224_v62 = vsel %vm169_vm11, 1.0, %v311_v17 }
  0xbb   :  { %v177_v11 = vrot.slane %v223_v61, %v355_v2  ;;  %v181_v12 = vrot.slane %v224_v62, %v355_v2 }
 0x123   :  { %v119_v4 = vpop.permute.xlu1 %118  ;;  %v117_v5 = vpop.permute.xlu0 %116 }
 0x124   :  { %v121_v8 = vsel %vm120_vm6, %v117_v5, %v119_v4  ;;  %v122_v6 = vsel %vm120_vm6, %v119_v4, %v117_v5 }
 0x125   :  { %v147_v7 = vmul.f32 %v142_v63, %v122_v6  ;;  %v148_v9 = vmul.f32 %v146_v0, %v121_v8 }
 0x127   :  { %v154_v14 = vpop.permute.xlu1 %153  ;;  %v152_v15 = vpop.permute.xlu0 %151  ;;  %v149_v20 = vadd.f32 %v147_v7, %v114_v43  ;;  %v150_v21 = vadd.f32 %v148_v9, %v115_v42 }
 0x128   :  { %v156_v16 = vsel %vm155_vm7, %v152_v15, %v154_v14  ;;  %v157_v17 = vsel %vm155_vm7, %v154_v14, %v152_v15 }
 0x129   :  { %v182_v22 = vmul.f32 %v177_v11, %v156_v16  ;;  %v183_v23 = vmul.f32 %v181_v12, %v157_v17 }
 0x12b   :  { %v184_v24 = vadd.f32 %v182_v22, %v149_v20  ;;  %v185_v25 = vadd.f32 %v183_v23, %v150_v21 }
 0x12d   :  { %v197_v26 = vmul.f32 %v190_v18, %v184_v24  ;;  %v198_v27 = vmul.f32 %v194_v19, %v185_v25 }
 0x12f   :  { %199 = vst [vmem:[#allocation7] sm:$0xff] %v197_v26  ;;  %200 = vst [vmem:[#allocation7 + $0x8] sm:$0xff] %v198_v27 }
 0x130   :  { %288 = shalt.err (!%p285_p6)
}
 0x131   :  { %s289_s12 = scalar_lea.hbm %s452_s2, 256 }
 0x132   :  { %p290_p7 = scmp.ne.s32.totalorder %s452_s2, %s289_s12  ;;  %p293_p8 = scmp.lt.u32.totalorder %s289_s12, %s452_s2 }
 0x134   :  { %p295_p9 = pnand %p293_p8, %p290_p7 }
 0x136   :  { %298 = shalt.err (!%p295_p9)
}
 0x137   :  { %210 = dma.vmem_to_hbm [thread:$0]  %s208_s8, 256, %s452_s2, [#allocation4]  }
 0x138   :  { %303 = dma.done.wait [#allocation4], 256  }
 0x139   :  { %304 = vsyncadd [#allocation4], 4294967040 }
 0x13a   :  { %214 = vsyncpa [#allocation3], 1 }
 0x13b   :  { %215 = vsyncpa [#allocation6], 1 }
 0x13c   :  { %216 = vsyncpa [#allocation4], 1 }

</bundles_post_ra>
